<compile_context>
chip_gen: v6e
topology: v6e:2x2x1
jax: 0.10.0
libtpu: 0.0.40
codegen_flags: <defaults>
</compile_context>

<pallas_src>
import functools

import jax
import jax.numpy as jnp
from jax import lax
from jax.experimental import pallas as pl
from jax.experimental.pallas import tpu as pltpu


# ---------------------------------------------------------------------------
# tile helpers
# ---------------------------------------------------------------------------

def _pick(dim, candidates):
    """Largest candidate that evenly divides `dim`; otherwise the full dim
    (a full-extent block is always layout-legal)."""
    for c in candidates:
        if dim >= c and dim % c == 0:
            return c
    return dim


_ROW_TILES = (512, 256, 128, 64, 32, 16, 8)    # sublane tiles for f32 rows
_LANE_TILES = (512, 256, 128)                  # lane / K tiles (128-aligned)
_ATTN_TILES = (256, 128, 64, 32, 16)           # bf16-friendly (16-sublane) tiles


# ---------------------------------------------------------------------------
# Kernel 1: tiled matmul  y = x @ W  (+ optional fused residual add)
#   grid = (M//tm, N//tn, K//tk); f32 VMEM accumulator zeroed at k==0 and
#   written out at k==last; bf16 MXU inputs.  Weight tiles sized so the
#   double-buffered working set stays well under the v7x 64 MiB VMEM budget.
# ---------------------------------------------------------------------------

def _matmul_kernel(x_ref, w_ref, o_ref, acc_ref):
    @pl.when(pl.program_id(2) == 0)
    def _():
        acc_ref[...] = jnp.zeros_like(acc_ref)

    acc_ref[...] += jnp.dot(x_ref[...].astype(jnp.bfloat16),
                            w_ref[...].astype(jnp.bfloat16),
                            preferred_element_type=jnp.float32)

    @pl.when(pl.program_id(2) == pl.num_programs(2) - 1)
    def _():
        o_ref[...] = acc_ref[...]


def _matmul_res_kernel(x_ref, w_ref, r_ref, o_ref, acc_ref):
    @pl.when(pl.program_id(2) == 0)
    def _():
        acc_ref[...] = jnp.zeros_like(acc_ref)

    acc_ref[...] += jnp.dot(x_ref[...].astype(jnp.bfloat16),
                            w_ref[...].astype(jnp.bfloat16),
                            preferred_element_type=jnp.float32)

    @pl.when(pl.program_id(2) == pl.num_programs(2) - 1)
    def _():
        o_ref[...] = r_ref[...] + acc_ref[...]          # fused residual add


def linear(x2d, w, residual=None):
    """y = x @ W (W stored (in, out), bf16). Optional fused residual add."""
    M, K = x2d.shape
    K2, N = w.shape
    assert K == K2
    tm = _pick(M, _ROW_TILES)
    tn = _pick(N, _LANE_TILES)
    tk = _pick(K, _LANE_TILES)
    grid = (M // tm, N // tn, K // tk)

    x_spec = pl.BlockSpec((tm, tk), lambda i, j, k: (i, k))
    w_spec = pl.BlockSpec((tk, tn), lambda i, j, k: (k, j))
    o_spec = pl.BlockSpec((tm, tn), lambda i, j, k: (i, j))
    scratch = [pltpu.VMEM((tm, tn), jnp.float32)]
    cp = pltpu.CompilerParams(
        dimension_semantics=("parallel", "parallel", "arbitrary"))

    if residual is None:
        return pl.pallas_call(
            _matmul_kernel,
            out_shape=jax.ShapeDtypeStruct((M, N), jnp.float32),
            grid=grid,
            in_specs=[x_spec, w_spec],
            out_specs=o_spec,
            scratch_shapes=scratch,
            compiler_params=cp,
        )(x2d, w)

    r_spec = pl.BlockSpec((tm, tn), lambda i, j, k: (i, j))
    return pl.pallas_call(
        _matmul_res_kernel,
        out_shape=jax.ShapeDtypeStruct((M, N), jnp.float32),
        grid=grid,
        in_specs=[x_spec, w_spec, r_spec],
        out_specs=o_spec,
        scratch_shapes=scratch,
        compiler_params=cp,
    )(x2d, w, residual)


# ---------------------------------------------------------------------------
# Kernel 2: fused RMSNorm + matmul   y = rmsnorm(x, g) @ W
#   grid = (M//tm, N//tn); K kept as a single block so the row reduction of
#   the norm stays in-register (no extra HBM pass for the normed activation).
# ---------------------------------------------------------------------------

def _rmsnorm_matmul_kernel(x_ref, g_ref, w_ref, o_ref, *, eps):
    x = x_ref[...]                                           # (tm, K) f32
    inv = lax.rsqrt(jnp.mean(x * x, axis=-1, keepdims=True) + eps)
    xn = (x * inv * g_ref[...]).astype(jnp.bfloat16)
    o_ref[...] = jnp.dot(xn, w_ref[...].astype(jnp.bfloat16),
                         preferred_element_type=jnp.float32)


def rmsnorm_linear(x2d, g, w, eps=1e-6):
    M, K = x2d.shape
    K2, N = w.shape
    assert K == K2
    tm = _pick(M, _ROW_TILES)
    tn = _pick(N, _LANE_TILES)
    return pl.pallas_call(
        functools.partial(_rmsnorm_matmul_kernel, eps=eps),
        out_shape=jax.ShapeDtypeStruct((M, N), jnp.float32),
        grid=(M // tm, N // tn),
        in_specs=[
            pl.BlockSpec((tm, K), lambda i, j: (i, 0)),
            pl.BlockSpec((1, K), lambda i, j: (0, 0)),
            pl.BlockSpec((K, tn), lambda i, j: (0, j)),
        ],
        out_specs=pl.BlockSpec((tm, tn), lambda i, j: (i, j)),
        compiler_params=pltpu.CompilerParams(
            dimension_semantics=("parallel", "parallel")),
    )(x2d, g, w)


# ---------------------------------------------------------------------------
# Kernel 3: fused RMSNorm + SwiGLU MLP + residual
#   o = residual + (silu(xn @ w1) * (xn @ w3)) @ w2,  xn = rmsnorm(x, g)
#   grid over row tiles; weight panels stay VMEM-resident across the grid.
#   Elementwise math kept in f32 (v5e has no bf16 VPU path).
# ---------------------------------------------------------------------------

def _mlp_kernel(x_ref, g_ref, w1_ref, w3_ref, w2_ref, r_ref, o_ref, *, eps):
    x = x_ref[...]
    inv = lax.rsqrt(jnp.mean(x * x, axis=-1, keepdims=True) + eps)
    xn = (x * inv * g_ref[...]).astype(jnp.bfloat16)
    a = jnp.dot(xn, w1_ref[...].astype(jnp.bfloat16),
                preferred_element_type=jnp.float32)
    b = jnp.dot(xn, w3_ref[...].astype(jnp.bfloat16),
                preferred_element_type=jnp.float32)
    h = ((a * jax.nn.sigmoid(a)) * b).astype(jnp.bfloat16)
    o_ref[...] = r_ref[...] + jnp.dot(h, w2_ref[...].astype(jnp.bfloat16),
                                      preferred_element_type=jnp.float32)


def mlp(x2d, g, w1, w3, w2, residual, eps=1e-6):
    M, D = x2d.shape
    inter = w1.shape[1]
    tm = _pick(M, _ROW_TILES)
    # TODO(synk): at real DeepSeek sizes the inter dimension also needs a
    # tiled accumulator so the weight slabs fit the 64 MiB v7x VMEM.
    return pl.pallas_call(
        functools.partial(_mlp_kernel, eps=eps),
        out_shape=jax.ShapeDtypeStruct((M, D), jnp.float32),
        grid=(M // tm,),
        in_specs=[
            pl.BlockSpec((tm, D), lambda i: (i, 0)),
            pl.BlockSpec((1, D), lambda i: (0, 0)),
            pl.BlockSpec((D, inter), lambda i: (0, 0)),
            pl.BlockSpec((D, inter), lambda i: (0, 0)),
            pl.BlockSpec((inter, D), lambda i: (0, 0)),
            pl.BlockSpec((tm, D), lambda i: (i, 0)),
        ],
        out_specs=pl.BlockSpec((tm, D), lambda i: (i, 0)),
        compiler_params=pltpu.CompilerParams(
            dimension_semantics=("parallel",)),
    )(x2d, g, w1, w3, w2, residual)


# ---------------------------------------------------------------------------
# Kernel 4: flash-style attention core with in-kernel causal mask.
#   q,k : (BH, T, dqk) bf16    v : (BH, T, dv) bf16    out : (BH, T, dv) f32
#   grid = (BH, T//tq, T//tk); online-softmax state in VMEM scratch; the
#   leading BH dim is squeezed so the kernel works on plain 2-D tiles.
# ---------------------------------------------------------------------------

_NEG_INF = -1e30   # finite mask value: avoids inf-inf NaNs, underflows to 0


def _flash_attn_kernel(q_ref, k_ref, v_ref, o_ref, m_sc, l_sc, acc_sc,
                       *, scale, tq, tk):
    qi = pl.program_id(1)
    ki = pl.program_id(2)

    @pl.when(ki == 0)
    def _():
        m_sc[...] = jnp.full_like(m_sc, _NEG_INF)
        l_sc[...] = jnp.zeros_like(l_sc)
        acc_sc[...] = jnp.zeros_like(acc_sc)

    q_start = qi * tq
    k_start = ki * tk

    # Skip KV tiles that lie entirely above the causal diagonal.
    @pl.when(k_start <= q_start + (tq - 1))
    def _():
        s = lax.dot_general(q_ref[...], k_ref[...],
                            (((1,), (1,)), ((), ())),
                            preferred_element_type=jnp.float32) * scale
        rows = q_start + lax.broadcasted_iota(jnp.int32, (tq, tk), 0)
        cols = k_start + lax.broadcasted_iota(jnp.int32, (tq, tk), 1)
        s = jnp.where(cols > rows, _NEG_INF, s)              # causal mask, no DMA

        m_prev = m_sc[...]
        m_new = jnp.maximum(m_prev, jnp.max(s, axis=-1, keepdims=True))
        alpha = jnp.exp(m_prev - m_new)
        p = jnp.exp(s - m_new)
        l_sc[...] = alpha * l_sc[...] + jnp.sum(p, axis=-1, keepdims=True)
        acc_sc[...] = alpha * acc_sc[...] + jnp.dot(
            p.astype(jnp.bfloat16), v_ref[...],
            preferred_element_type=jnp.float32)
        m_sc[...] = m_new

    @pl.when(ki == pl.num_programs(2) - 1)
    def _():
        o_ref[...] = acc_sc[...] * pl.reciprocal(l_sc[...], approx=True)


def attention_core(q, k, v, scale):
    """q, k: (BH, T, dqk) bf16; v: (BH, T, dv) bf16 -> (BH, T, dv) f32."""
    BH, T, dqk = q.shape
    dv = v.shape[-1]
    tq = _pick(T, _ATTN_TILES)
    tk = _pick(T, _ATTN_TILES)
    return pl.pallas_call(
        functools.partial(_flash_attn_kernel, scale=scale, tq=tq, tk=tk),
        out_shape=jax.ShapeDtypeStruct((BH, T, dv), jnp.float32),
        grid=(BH, T // tq, T // tk),
        in_specs=[
            pl.BlockSpec((None, tq, dqk), lambda b, i, j: (b, i, 0)),
            pl.BlockSpec((None, tk, dqk), lambda b, i, j: (b, j, 0)),
            pl.BlockSpec((None, tk, dv), lambda b, i, j: (b, j, 0)),
        ],
        out_specs=pl.BlockSpec((None, tq, dv), lambda b, i, j: (b, i, 0)),
        scratch_shapes=[
            pltpu.VMEM((tq, 1), jnp.float32),      # running max
            pltpu.VMEM((tq, 1), jnp.float32),      # running sum
            pltpu.VMEM((tq, dv), jnp.float32),     # output accumulator
        ],
        compiler_params=pltpu.CompilerParams(
            dimension_semantics=("parallel", "parallel", "arbitrary")),
    )(q, k, v)


# ---------------------------------------------------------------------------
# Plain-JAX glue (RoPE, reshapes) and the model forward
# ---------------------------------------------------------------------------

def precompute_freqs_cis(rope_dim, max_seq_len, theta=10000.0):
    # max_seq_len <= original_seq_len -> simple RoPE path (no YaRN correction).
    freqs = 1.0 / (theta ** (jnp.arange(0, rope_dim, 2, dtype=jnp.float32) / rope_dim))
    t = jnp.arange(max_seq_len, dtype=jnp.float32)
    ang = jnp.outer(t, freqs)                                # (S, rope_dim/2)
    return jnp.cos(ang), jnp.sin(ang)


def apply_rotary_emb(x, cos, sin):
    # interleaved-pair rotation (torch.view_as_complex convention); x: (B,T,H,R)
    # TODO(synk): could be fused in-kernel with a pltpu.roll even/odd swizzle.
    B, T, H, R = x.shape
    xr = x.reshape(B, T, H, R // 2, 2)
    x0, x1 = xr[..., 0], xr[..., 1]
    c = cos[None, :, None, :]
    s = sin[None, :, None, :]
    y0 = x0 * c - x1 * s
    y1 = x0 * s + x1 * c
    return jnp.stack([y0, y1], axis=-1).reshape(B, T, H, R)


def mla_attention(p, h2, B, T, cos, sin, cfg):
    """Multi-head Latent Attention (q_lora_rank=0, start_pos=0).
    Takes the raw residual stream h2 (B*T, D); attn_norm is fused into the
    q / kv_a projections.  Returns pre-wo output of shape (B*T, H*dv)."""
    H = cfg['n_heads']
    dn, dr, dv = cfg['qk_nope_head_dim'], cfg['qk_rope_head_dim'], cfg['v_head_dim']
    dqk = dn + dr
    klr = cfg['kv_lora_rank']

    q = rmsnorm_linear(h2, p['attn_norm'], p['wq']).reshape(B, T, H, dqk)
    kv = rmsnorm_linear(h2, p['attn_norm'], p['wkv_a'])      # (B*T, klr + dr)

    q_nope, q_pe = q[..., :dn], q[..., dn:]
    q_pe = apply_rotary_emb(q_pe, cos, sin)

    kv_c = kv[:, :klr]
    k_pe = apply_rotary_emb(kv[:, klr:].reshape(B, T, 1, dr), cos, sin)

    # kv_norm fused into the wkv_b up-projection
    kvb = rmsnorm_linear(kv_c, p['kv_norm'], p['wkv_b']).reshape(B, T, H, dn + dv)
    k_nope, v = kvb[..., :dn], kvb[..., dn:]

    q_full = jnp.concatenate([q_nope, q_pe], axis=-1)                    # (B,T,H,dqk)
    k_full = jnp.concatenate(
        [k_nope, jnp.broadcast_to(k_pe, (B, T, H, dr))], axis=-1)        # (B,T,H,dqk)

    # TODO(synk): the head transposes below are XLA relayouts; a (B, H) grid
    # index_map would remove them but needs sub-(8,128) 4-D blocks.
    qf = q_full.transpose(0, 2, 1, 3).reshape(B * H, T, dqk).astype(jnp.bfloat16)
    kf = k_full.transpose(0, 2, 1, 3).reshape(B * H, T, dqk).astype(jnp.bfloat16)
    vf = v.transpose(0, 2, 1, 3).reshape(B * H, T, dv).astype(jnp.bfloat16)

    out = attention_core(qf, kf, vf, dqk ** -0.5)            # (B*H, T, dv) f32
    return out.reshape(B, H, T, dv).transpose(0, 2, 1, 3).reshape(B * T, H * dv)


def block_forward(p, h, cos, sin, cfg):
    B, T, D = h.shape
    h2 = h.reshape(B * T, D)
    attn = mla_attention(p, h2, B, T, cos, sin, cfg)
    h2 = linear(attn, p['wo'], residual=h2)                  # h + attn proj (fused add)
    h2 = mlp(h2, p['ffn_norm'], p['w1'], p['w3'], p['w2'], residual=h2)
    return h2.reshape(B, T, D)


def transformer_forward(params, tokens, cfg, start_pos=0):
    B, T = tokens.shape
    # TODO(synk): embedding gather kept as JAX indexing (no Pallas gather kernel).
    h = params['embed'][tokens]                              # (B, T, D) f32
    cos = params['rope_cos'][start_pos:start_pos + T]
    sin = params['rope_sin'][start_pos:start_pos + T]
    for lp in params['layers']:
        h = block_forward(lp, h, cos, sin, cfg)
    # final norm is per-row, so slice the last token first, then fuse norm+head
    h_last = h[:, -1, :]                                     # (B, D)
    return rmsnorm_linear(h_last, params['norm_w'], params['head_w'])


# ---------------------------------------------------------------------------
# Deterministic parameter init (synthetic; no checkpoint)
# ---------------------------------------------------------------------------

def init_params(key, cfg):
    D, V = cfg['dim'], cfg['vocab_size']
    H = cfg['n_heads']
    dn, dr, dv = cfg['qk_nope_head_dim'], cfg['qk_rope_head_dim'], cfg['v_head_dim']
    dqk = dn + dr
    klr = cfg['kv_lora_rank']
    inter = cfg['inter_dim']

    keys = iter(jax.random.split(key, 4 + 16 * cfg['n_layers']))

    def w(shape, scale=0.02):
        # bf16 weights: MXU-native and half the HBM traffic vs f32
        return (scale * jax.random.normal(next(keys), shape, jnp.float32)
                ).astype(jnp.bfloat16)

    params = {
        'embed': 0.02 * jax.random.normal(next(keys), (V, D), jnp.float32),
        'norm_w': jnp.ones((1, D), jnp.float32),
        'head_w': w((D, V)),
        'layers': [],
    }
    params['rope_cos'], params['rope_sin'] = precompute_freqs_cis(
        dr, cfg['max_seq_len'], cfg['rope_theta'])

    for _ in range(cfg['n_layers']):
        # n_dense_layers == n_layers -> every layer uses the dense MLP.
        # TODO(synk): DeepSeekMoE (routed/shared experts + gating) not modeled.
        params['layers'].append({
            'attn_norm': jnp.ones((1, D), jnp.float32),
            'ffn_norm': jnp.ones((1, D), jnp.float32),
            'wq': w((D, H * dqk)),
            'wkv_a': w((D, klr + dr)),
            'kv_norm': jnp.ones((1, klr), jnp.float32),
            'wkv_b': w((klr, H * (dn + dv))),
            'wo': w((H * dv, D)),
            'w1': w((D, inter)),
            'w2': w((inter, D)),
            'w3': w((D, inter)),
        })
    return params


# ---------------------------------------------------------------------------
# Demo
# ---------------------------------------------------------------------------

if __name__ == "__main__":
    cfg = dict(
        vocab_size=64,
        dim=32,
        inter_dim=64,
        n_layers=2,
        n_dense_layers=2,
        n_heads=2,
        kv_lora_rank=16,
        qk_nope_head_dim=16,
        qk_rope_head_dim=8,
        v_head_dim=16,
        max_seq_len=16,
        rope_theta=10000.0,
    )
    # TODO(synk): world_size>1 collectives (all_reduce / all_gather), KV-cache
    # reuse for start_pos>0, YaRN rope correction and fp8 Linear not modeled.

    key = jax.random.PRNGKey(0)
    pkey, tkey = jax.random.split(key)
    params = init_params(pkey, cfg)

    B, T = 2, 8
    tokens = jax.random.randint(tkey, (B, T), 0, cfg['vocab_size'], dtype=jnp.int32)

    logits = transformer_forward(params, tokens, cfg, start_pos=0)
    logits = jax.block_until_ready(logits)
    assert logits.shape == (B, cfg['vocab_size'])
    assert bool(jnp.all(jnp.isfinite(logits)))
    print("KERNEL_OK")
</pallas_src>

<mosaic_0001>
module attributes {stable_mosaic.version = 11 : i64} {
  func.func @_rmsnorm_matmul_kernel(%arg0: i32, %arg1: i32, %arg2: memref<16x32xf32, #tpu.memory_space<vmem>>, %arg3: memref<1x32xf32, #tpu.memory_space<vmem>>, %arg4: memref<32x48xbf16, #tpu.memory_space<vmem>>, %arg5: memref<16x48xf32, #tpu.memory_space<vmem>>) attributes {dimension_semantics = [#tpu.dimension_semantics<parallel>, #tpu.dimension_semantics<parallel>], iteration_bounds = array<i64: 1, 1>, scalar_prefetch = 0 : i64, scratch_operands = 0 : i64, tpu.core_type = #tpu.core_type<tc>, window_params = [{transform_indices = @transform_0, window_bounds = array<i64: 16, 32>}, {pipeline_mode = #tpu.pipeline_mode<synchronous>, transform_indices = @transform_1, window_bounds = array<i64: 1, 32>}, {transform_indices = @transform_2, window_bounds = array<i64: 32, 48>}, {transform_indices = @transform_3, window_bounds = array<i64: 16, 48>}]} {
    %c0 = arith.constant 0 : index
    %c0_0 = arith.constant 0 : index
    %0 = vector.load %arg2[%c0, %c0_0] : memref<16x32xf32, #tpu.memory_space<vmem>>, vector<16x32xf32>
    %1 = arith.mulf %0, %0 : vector<16x32xf32>
    %cst = arith.constant dense<0.000000e+00> : vector<16xf32>
    %2 = vector.multi_reduction <add>, %1, %cst [1] : vector<16x32xf32> to vector<16xf32>
    %3 = vector.shape_cast %2 : vector<16xf32> to vector<16x1xf32>
    %cst_1 = arith.constant 3.200000e+01 : f32
    %4 = vector.broadcast %cst_1 : f32 to vector<16x1xf32>
    %5 = arith.divf %3, %4 : vector<16x1xf32>
    %cst_2 = arith.constant 9.99999997E-7 : f32
    %6 = vector.broadcast %cst_2 : f32 to vector<16x1xf32>
    %7 = arith.addf %5, %6 : vector<16x1xf32>
    %8 = math.rsqrt %7 : vector<16x1xf32>
    %9 = vector.broadcast %8 : vector<16x1xf32> to vector<16x32xf32>
    %10 = arith.mulf %0, %9 : vector<16x32xf32>
    %c0_3 = arith.constant 0 : index
    %c0_4 = arith.constant 0 : index
    %11 = vector.load %arg3[%c0_3, %c0_4] : memref<1x32xf32, #tpu.memory_space<vmem>>, vector<1x32xf32>
    %12 = vector.broadcast %11 : vector<1x32xf32> to vector<16x32xf32>
    %13 = arith.mulf %10, %12 : vector<16x32xf32>
    %14 = arith.truncf %13 : vector<16x32xf32> to vector<16x32xbf16>
    %c0_5 = arith.constant 0 : index
    %c0_6 = arith.constant 0 : index
    %15 = vector.load %arg4[%c0_5, %c0_6] : memref<32x48xbf16, #tpu.memory_space<vmem>>, vector<32x48xbf16>
    %cst_7 = arith.constant dense<0.000000e+00> : vector<16x48xf32>
    %16 = tpu.matmul %14, %15, %cst_7 {dimension_numbers = #tpu.dot_dimension_numbers<[1], [0], [0], [1], [0, 0, 1, 1], [], []>} : vector<16x32xbf16>, vector<32x48xbf16>, vector<16x48xf32> -> vector<16x48xf32>
    %c0_8 = arith.constant 0 : index
    %c0_9 = arith.constant 0 : index
    %17 = vector.load %arg5[%c0_8, %c0_9] : memref<16x48xf32, #tpu.memory_space<vmem>>, vector<16x48xf32>
    tpu.vector_store %arg5[%c0_8, %c0_9], %16 {strides = array<i32>} : memref<16x48xf32, #tpu.memory_space<vmem>>, vector<16x48xf32>,
    return
  }
  func.func @transform_0(%arg0: i32, %arg1: i32) -> (i32, i32) {
    %c0_i32 = arith.constant 0 : i32
    %c0_i32_0 = arith.constant 0 : i32
    return %arg0, %c0_i32 : i32, i32
  }
  func.func @transform_1(%arg0: i32, %arg1: i32) -> (i32, i32) {
    %c0_i32 = arith.constant 0 : i32
    %c0_i32_0 = arith.constant 0 : i32
    %c0_i32_1 = arith.constant 0 : i32
    return %c0_i32, %c0_i32_0 : i32, i32
  }
  func.func @transform_2(%arg0: i32, %arg1: i32) -> (i32, i32) {
    %c0_i32 = arith.constant 0 : i32
    %c0_i32_0 = arith.constant 0 : i32
    return %c0_i32, %arg1 : i32, i32
  }
  func.func @transform_3(%arg0: i32, %arg1: i32) -> (i32, i32) {
    %c0_i32 = arith.constant 0 : i32
    return %arg0, %arg1 : i32, i32
  }
}

</mosaic_0001>

<bundles_post_ra>
// kernel: tpu_custom_call.1
= control target key start
LH: loop header
LB: loop body
LE: loop exit
PB: predicated region body
PF: predicated region fallthrough
CT: control target
= control target key end

     0   :  { %8 = vsyncpa [#allocation3], 0  ;;  %s301_s0 = inlined_call_operand.hbm [shape: f32[16,32], index: 0, kind: input, shape index: {}]   ;;  %s302_s1 = inlined_call_operand.vmem [shape: f32[1,32], index: 1, kind: input, shape index: {}]   ;;  %s303_s2 = inlined_call_operand.hbm [shape: bf16[32,48], index: 2, kind: input, shape index: {}]   ;;  %s304_s3 = inlined_call_operand.hbm [shape: f32[16,48], index: 3, kind: output, shape index: {}]  }
   0x1   :  { %9 = vsyncpa [#allocation6], 0 }
   0x2   :  { %10 = vsyncpa [#allocation4], 0  ;;  %s251_s12 = smov [#allocation2]  }
   0x3   :  { %s16_s13 = sshll.u32 %s251_s12, 4  ;;  %s17_s13 = int_to_ptr.vmem [resolvable:$true] %s16_s13 }
   0x4   :  { %s193_s14 = scalar_lea.vmem %s17_s13, 256  ;;  %p198_p1 = scmp.lt.s32.totalorder %s17_s13, %s17_s13 }
   0x5   :  { %p194_p0 = scmp.ne.s32.totalorder %s17_s13, %s193_s14  ;;  %p199_p2 = scmp.lt.s32.totalorder %s193_s14, %s193_s14 }
   0x7   :  { %p200_p3 = por %p199_p2, %p198_p1 }
   0x9   :  { %p201_p4 = pnand %p200_p3, %p194_p0 }
   0xb   :  { %204 = shalt.err (!%p201_p4)
}
   0xc   :  { %s252_s15 = smov 128   ;;  %s253_s16 = smov 8  }
   0xd   :  { %22 = dma.hbm_to_vmem [thread:$0]  %s301_s0, 256, %s17_s13, [#allocation3], %s252_s15, %s252_s15, %s253_s16  }
   0xe   :  { %s254_s19 = smov [#allocation5]  }
   0xf   :  { %s30_s20 = sshll.u32 %s254_s19, 4  ;;  %s31_s20 = int_to_ptr.vmem [resolvable:$true] %s30_s20 }
  0x10   :  { %s213_s21 = scalar_lea.vmem %s31_s20, 256  ;;  %p218_p6 = scmp.lt.s32.totalorder %s31_s20, %s31_s20 }
  0x11   :  { %p214_p5 = scmp.ne.s32.totalorder %s31_s20, %s213_s21  ;;  %p219_p7 = scmp.lt.s32.totalorder %s213_s21, %s213_s21 }
  0x13   :  { %p220_p8 = por %p219_p7, %p218_p6 }
  0x15   :  { %p221_p9 = pnand %p220_p8, %p214_p5 }
  0x17   :  { %224 = shalt.err (!%p221_p9)
}
  0x18   :  { %s255_s22 = smov 64   ;;  %s256_s23 = smov 4  }
  0x19   :  { %36 = dma.hbm_to_vmem [thread:$0]  %s303_s2, 256, %s31_s20, [#allocation6], %s255_s22, %s255_s22, %s256_s23  }
  0x1a   :  { %245 = dma.done.wait [#allocation3], 256  }
  0x1b   :  { %246 = vsyncadd [#allocation3], 4294967040 }
  0x1c   :  { %247 = dma.done.wait [#allocation6], 256  }
  0x1d   :  { %248 = vsyncadd [#allocation6], 4294967040  ;;  %v44_v0 = vld [vmem:[#allocation2] sm:$0xff]  ;;  %vm48_vm0 = vcmask 261120   ;;  %v45_v1 = vld [vmem:[#allocation2 + $0x8] sm:$0xff]  ;;  %v257_v7 = vmov 0.0  }
  0x1e   :  { %v46_v2 = vmul.f32 %v44_v0, %v44_v0  ;;  %v47_v3 = vmul.f32 %v45_v1, %v45_v1  ;;  %v179_v6 = vld [vmem:[#allocation5 + $0x8] sm:$0xff]   ;;  %162 = vmatprep.subr.bf16.mxu0 %v257_v7  ;;  %vm258_vm1 = vmmov 0   ;;  %v180_v8 = vld [vmem:[#allocation5] sm:$0xff]   ;;  %v155_v18 = vld [vmem:[%s302_s1] ss:$0 sm:$0xff]  ;;  %vm134_vm2 = vcmask 392192  }
  0x1f   :  { %166 = vmatprep.mubr.msk.bf16.mxu0 %vm258_vm1, %v257_v7  ;;  %163 = vmatpush3.bf16.msra.mxu0 %v179_v6  ;;  %s259_s26 = smov [#allocation7]  }
  0x20   :  { %v49_v4 = vsel %vm48_vm0, %v46_v2, 0.0  ;;  %v52_v5 = vsel %vm48_vm0, %v47_v3, 0.0  ;;  %164 = vmatprep.subr.bf16.mxu0 %v257_v7  ;;  %s142_s27 = sshll.u32 %s259_s26, 4  ;;  %s143_s27 = int_to_ptr.vmem [resolvable:$true] %s142_s27 }
  0x21   :  { %50 = vadd.xlane.f32.xlu0 %v49_v4  ;;  %s225_s28 = scalar_lea.vmem %s143_s27, 256  ;;  %p230_p11 = scmp.lt.s32.totalorder %s143_s27, %s143_s27 }
  0x22   :  { %p226_p10 = scmp.ne.s32.totalorder %s143_s27, %s225_s28  ;;  %p231_p12 = scmp.lt.s32.totalorder %s225_s28, %s225_s28 }
  0x23   :  { %165 = vmatpush3.bf16.msra.mxu0 %v180_v8 }
  0x24   :  { %p232_p13 = por %p231_p12, %p230_p11 }
  0x25   :  { %53 = vadd.xlane.f32.xlu0 %v52_v5 }
  0x26   :  { %p233_p0 = pnand %p232_p13, %p226_p10 }
  0xaa   :  { %v51_v9 = vpop.xlane.xlu0 %50 }
  0xab   :  { %v56_v10 = vmul.f32 0.03125, %v51_v9 }
  0xad   :  { %v58_v11 = vadd.f32 1e-06, %v56_v10 }
  0xae   :  { %v54_v12 = vpop.xlane.xlu0 %53 }
  0xaf   :  { %181 = vrsqrt.f32 %v58_v11  ;;  %v57_v13 = vmul.f32 0.03125, %v54_v12 }
  0xb1   :  { %v59_v14 = vadd.f32 1e-06, %v57_v13 }
  0xb3   :  { %183 = vrsqrt.f32 %v59_v14 }
  0xbc   :  { %v182_v15 = vpop.eup %181 }
  0xbd   :  { %v62_v16 = vmul.f32 %v182_v15, %v44_v0 }
  0xbf   :  { %v71_v20 = vmul.f32 %v155_v18, %v62_v16 }
  0xc0   :  { %v184_v17 = vpop.eup %183 }
  0xc1   :  { %v63_v19 = vmul.f32 %v184_v17, %v45_v1 }
  0xc3   :  { %v72_v21 = vmul.f32 %v155_v18, %v63_v19 }
  0xc5   :  { %v73_v22 = vpack.c.bf16 %v72_v21, %v71_v20 }
  0xc7   :  { %167 = vmatmul.mubr.msk.bf16.vlgmr.msra.gmra.mxu0 %vm48_vm0, %v73_v22 }
 0x187   :  { %v127_v23 = vpop.f32.mrf.mxu0 }
 0x188   :  { %135 = vst.msk [vmem:[#allocation7] sm:$0xff] %vm134_vm2, %v127_v23 }
 0x189   :  { %v168_v24 = vpop.f32.mrf.mxu0 }
 0x18b   :  { %v130_v25 = vpop.f32.mrf.mxu0 }
 0x18c   :  { %136 = vst.msk [vmem:[#allocation7 + $0x8] sm:$0xff] %vm134_vm2, %v130_v25 }
 0x18d   :  { %v169_v26 = vpop.f32.mrf.mxu0 }
 0x18e   :  { %236 = shalt.err (!%p233_p0)
}
 0x18f   :  { %148 = dma.vmem_to_hbm [thread:$0]  %s143_s27, 256, %s304_s3, [#allocation4], %s252_s15, %s252_s15, %s253_s16  }
 0x190   :  { %249 = dma.done.wait [#allocation4], 256  }
 0x191   :  { %250 = vsyncadd [#allocation4], 4294967040 }
 0x192   :  { %152 = vsyncpa [#allocation3], 1 }
 0x193   :  { %153 = vsyncpa [#allocation6], 1 }
 0x194   :  { %154 = vsyncpa [#allocation4], 1 }

</bundles_post_ra>
